<compile_context>
chip_gen: v5e
topology: v5e:2x2
jax: 0.10.0
libtpu: 0.0.40
codegen_flags: <defaults>
</compile_context>

<pallas_src>
import jax
import jax.numpy as jnp
from jax.experimental import pallas as pl
from jax.experimental.pallas import tpu as pltpu


def _disp_reg_kernel(w_ref, x_ref, o_ref):
    # w_ref: (1, D) disparity weights (0..D-1) in the input dtype, constant
    #        across the grid (index_map always returns block (0, 0)).
    # x_ref: (D, TS) input slab for one (batch, spatial-tile) grid point,
    #        dtype preserved through the DMA (bf16 stays bf16).
    # o_ref: (1, TS) float32 output slab.
    o_ref[...] = jnp.dot(w_ref[...], x_ref[...],
                         preferred_element_type=jnp.float32)


def _vmem_capacity_bytes() -> int:
    # Per-TensorCore VMEM capacity; fall back by device kind if the query
    # is unavailable (v7x: 64 MiB/TC, v5e/v6e: 128 MiB).
    try:
        info = pltpu.get_tpu_info()
        cap = int(getattr(info, "vmem_capacity_bytes", 0))
        if cap > 0:
            return cap
    except Exception:
        pass
    try:
        kind = jax.devices()[0].device_kind.lower()
    except Exception:
        kind = ""
    if "v7" in kind:
        return 64 * 1024 * 1024
    return 128 * 1024 * 1024


def _round_up(v: int, m: int) -> int:
    return ((v + m - 1) // m) * m


def _choose_spatial_tile(D: int, S: int, itemsize: int,
                         vmem_bytes: int, B: int) -> int:
    # One double-buffered (D, TS) input block dominates VMEM; give a single
    # block ~1/6 of the chip's capacity (double buffering + output buffers +
    # compiler scratch headroom).
    block_budget = max(vmem_bytes // 6, 1 << 20)
    max_ts = max(((block_budget // (D * itemsize)) // 128) * 128, 128)

    # Guarantee >= 2 total grid points so v7x's 2 TensorCores both get work
    # (grid axes are "parallel"); prefer a few more tiles on large spatial
    # extents since tiles >= 512 lanes already sit near the HBM roofline and
    # per-step overhead is only ~0.35 us.
    want_tiles = 1 if B >= 2 else 2
    if S >= 8 * 512:
        want_tiles = max(want_tiles, 4)
    ts_cap = max(_round_up(-(-S // want_tiles), 128), 128)

    return min(max_ts, ts_cap)


def disparity_regression(x: jax.Array) -> jax.Array:
    """x: [B, D, H, W] (softmax over disparity dim). Returns float32 [B, H, W]."""
    B, D, H, W = x.shape
    S = H * W
    itemsize = jnp.dtype(x.dtype).itemsize

    vmem_bytes = _vmem_capacity_bytes()
    ts = _choose_spatial_tile(D, S, itemsize, vmem_bytes, B)

    in_block = D * ts * itemsize
    out_block = ts * 4                       # f32 output
    w_block = D * itemsize
    vmem_limit = int(min(vmem_bytes * 0.9,
                         max(2 * in_block + 2 * out_block + w_block + (4 << 20),
                             32 << 20)))

    x3 = x.reshape(B, D, S)                  # free: contiguous dim merge

    # Disparity weights 0..D-1 in the input dtype so the MXU consumes the
    # input natively (no whole-block upcast for bf16). Integers up to 256 are
    # exact in bf16, comfortably above PSMNet's maxdisp (typ. 192).
    disp_w = jnp.arange(D, dtype=jnp.float32).astype(x.dtype).reshape(1, D)

    out3 = pl.pallas_call(
        _disp_reg_kernel,
        out_shape=jax.ShapeDtypeStruct((B, 1, S), jnp.float32),
        grid_spec=pltpu.PrefetchScalarGridSpec(
            num_scalar_prefetch=0,
            grid=(B, pl.cdiv(S, ts)),
            in_specs=[
                # Constant index_map: the tiny weights block is DMA'd once and
                # reused for every grid step.
                pl.BlockSpec((1, D), lambda b, s: (0, 0)),
                pl.BlockSpec((pl.Squeezed(), D, ts), lambda b, s: (b, 0, s)),
            ],
            out_specs=pl.BlockSpec((pl.Squeezed(), 1, ts),
                                   lambda b, s: (b, 0, s)),
        ),
        compiler_params=pltpu.CompilerParams(
            dimension_semantics=("parallel", "parallel"),
            vmem_limit_bytes=vmem_limit,
        ),
    )(disp_w, x3)

    return out3.reshape(B, H, W)


if __name__ == "__main__":
    key = jax.random.PRNGKey(0)
    B, maxdisp, H, W = 2, 8, 16, 16          # x: [B, D, H, W], D == maxdisp
    logits = jax.random.normal(key, (B, maxdisp, H, W), dtype=jnp.float32)
    # In PSMNet, x is a softmax over the disparity dimension.
    x = jax.nn.softmax(logits, axis=1)

    out = disparity_regression(x)
    out = jax.block_until_ready(out)

    # Reference check (plain JAX, mirrors the PyTorch forward exactly).
    disp = jnp.arange(maxdisp, dtype=jnp.float32).reshape(1, maxdisp, 1, 1)
    ref = jnp.sum(x.astype(jnp.float32) * disp, axis=1)
    assert out.shape == (B, H, W)
    assert out.dtype == jnp.float32
    assert jnp.allclose(out, ref, atol=1e-4, rtol=1e-4)

    print("KERNEL_OK")
</pallas_src>

<mosaic_0001>
module attributes {stable_mosaic.version = 11 : i64} {
  func.func @_disp_reg_kernel(%arg0: i32, %arg1: i32, %arg2: memref<1x8xf32, #tpu.memory_space<vmem>>, %arg3: memref<1x8x256xf32, #tpu.memory_space<vmem>>, %arg4: memref<1x1x256xf32, #tpu.memory_space<vmem>>) attributes {dimension_semantics = [#tpu.dimension_semantics<parallel>, #tpu.dimension_semantics<parallel>], iteration_bounds = array<i64: 2, 1>, scalar_prefetch = 0 : i64, scratch_operands = 0 : i64, tpu.core_type = #tpu.core_type<tc>, window_params = [{pipeline_mode = #tpu.pipeline_mode<synchronous>, transform_indices = @transform_0, window_bounds = array<i64: 1, 8>}, {transform_indices = @transform_1, window_bounds = array<i64: 1, 8, 256>}, {transform_indices = @transform_2, window_bounds = array<i64: 1, 1, 256>}]} {
    %c0 = arith.constant 0 : index
    %c0_0 = arith.constant 0 : index
    %0 = vector.load %arg2[%c0, %c0_0] : memref<1x8xf32, #tpu.memory_space<vmem>>, vector<1x8xf32>
    %c0_1 = arith.constant 0 : index
    %c0_2 = arith.constant 0 : index
    %c0_3 = arith.constant 0 : index
    %1 = vector.load %arg3[%c0_1, %c0_2, %c0_3] : memref<1x8x256xf32, #tpu.memory_space<vmem>>, vector<1x8x256xf32>
    %2 = vector.shape_cast %1 : vector<1x8x256xf32> to vector<8x256xf32>
    %cst = arith.constant dense<0.000000e+00> : vector<1x256xf32>
    %3 = tpu.matmul %0, %2, %cst {dimension_numbers = #tpu.dot_dimension_numbers<[1], [0], [0], [1], [0, 0, 1, 1], [], []>} : vector<1x8xf32>, vector<8x256xf32>, vector<1x256xf32> -> vector<1x256xf32>
    %c0_4 = arith.constant 0 : index
    %c0_5 = arith.constant 0 : index
    %c0_6 = arith.constant 0 : index
    %4 = vector.load %arg4[%c0_4, %c0_5, %c0_6] : memref<1x1x256xf32, #tpu.memory_space<vmem>>, vector<1x1x256xf32>
    %5 = vector.shape_cast %4 : vector<1x1x256xf32> to vector<1x256xf32>
    %6 = vector.shape_cast %3 : vector<1x256xf32> to vector<1x1x256xf32>
    tpu.vector_store %arg4[%c0_4, %c0_5, %c0_6], %6 {strides = array<i32>} : memref<1x1x256xf32, #tpu.memory_space<vmem>>, vector<1x1x256xf32>,
    return
  }
  func.func @transform_0(%arg0: i32, %arg1: i32) -> (i32, i32) {
    %c0_i32 = arith.constant 0 : i32
    %c0_i32_0 = arith.constant 0 : i32
    %c0_i32_1 = arith.constant 0 : i32
    return %c0_i32, %c0_i32_0 : i32, i32
  }
  func.func @transform_1(%arg0: i32, %arg1: i32) -> (i32, i32, i32) {
    %c0_i32 = arith.constant 0 : i32
    %c0_i32_0 = arith.constant 0 : i32
    return %arg0, %c0_i32, %arg1 : i32, i32, i32
  }
  func.func @transform_2(%arg0: i32, %arg1: i32) -> (i32, i32, i32) {
    %c0_i32 = arith.constant 0 : i32
    %c0_i32_0 = arith.constant 0 : i32
    return %arg0, %c0_i32, %arg1 : i32, i32, i32
  }
}

</mosaic_0001>

<bundles_post_ra>
// kernel: tpu_custom_call.1
= control target key start
LH: loop header
LB: loop body
LE: loop exit
PB: predicated region body
PF: predicated region fallthrough
CT: control target
= control target key end

     0   :  { %7 = vsyncpa [#allocation3], 0  ;;  %s774_s0 = inlined_call_operand.hbm [shape: f32[1,8], index: 0, kind: input, shape index: {}]   ;;  %s775_s1 = inlined_call_operand.hbm [shape: f32[2,8,256], index: 1, kind: input, shape index: {}]   ;;  %s776_s2 = inlined_call_operand.hbm [shape: f32[2,1,256], index: 2, kind: output, shape index: {}]  }
   0x1   :  { %8 = vsyncpa [#allocation6], 0 }
   0x2   :  { %10 = vsyncpa [#allocation6 + $0x1], 0 }
   0x3   :  { %11 = vsyncpa [#allocation4], 0 }
   0x4   :  { %13 = vsyncpa [#allocation4 + $0x1], 0  ;;  %s624_s9 = smov 0   ;;  %s626_s10 = smov 0  }
   0x5   :  { %s628_s11 = smov 0   ;;  %s630_s12 = smov 0  }
   0x6   :  { %s632_s13 = smov 0   ;;  %s634_s14 = smov 0  }
   0x7 LB: > { %s368_s15 = sadd.s32 4294967295, %s606_s14   ;;  %s369_s16 = sadd.s32 4294967294, %s606_s14   ;;  %s606_s14 = sphi %s634_s14, %s19_s14   ;;  %s602_s13 = sphi %s632_s13, %s788_s13   ;;  %s598_s12 = sphi %s630_s12, %s787_s12   ;;  %s594_s11 = sphi %s628_s11, %s786_s11   ;;  %s590_s10 = sphi %s626_s10, %s785_s10   ;;  %s586_s9 = sphi %s624_s9, %s784_s9  }
   0x8   : > { %p74_p0 = scmp.ne.s32.totalorder %s590_s10, %s586_s9  ;;  %p658_p1 = scmp.eq.s32.totalorder %s368_s15, 0 }
   0x9   : > { %p662_p2 = scmp.eq.s32.totalorder %s368_s15, 1  ;;  %p106_p3 = scmp.eq.s32.totalorder %s369_s16, 1 }
   0xa   : > { %p668_p4 = por %p658_p1, %p74_p0  ;;  %p370_p5 = scmp.ge.s32.totalorder %s606_s14, 1 }
   0xb   : > { %p673_p6 = por %p106_p3, %p74_p0  ;;  %p113_p7 = scmp.lt.s32.totalorder %s606_s14, 3 }
   0xc   : > { %s125_s23 = sshll.u32 %s774_s0, 4  ;;  %p372_p9 = scmp.ge.s32.totalorder %s606_s14, 2  ;;  %s126_s23 = int_to_ptr.hbm [resolvable:$true] %s125_s23 }
   0xd   : > { %p681_p8 = pnand %p370_p5, %p113_p7  ;;  %s608_s25 = smov [#allocation2]  }
   0xe   : > { %s127_s26 = sshll.u32 %s608_s25, 4  ;;  %s31_s27 = sadd.s32 1, %s602_s13  ;;  %s128_s26 = int_to_ptr.vmem [resolvable:$true] %s127_s26 }
   0xf   : > { %p395_p10 = pneg %p681_p8  ;;  %p33_p12 = scmp.ge.s32.totalorder %s31_s27, 2 }
  0x10   : > { %s61_s28 = sadd.s32 1, %s594_s11  ;;  %p68_p13 = scmp.ne.s32.totalorder %s594_s11, %s590_s10 }
  0x11   : > { %p396_p11 = pnand %p395_p10, %p658_p1  ;;  %p69_p0 = scmp.eq.s32.totalorder %s606_s14, 0 }
  0x12   : > { %s790_s27 = smov (%p33_p12, %s31_s27), 0  ;;  %p703_p5 = por %p662_p2, %p68_p13 }
  0x13   : > { %398 = dma.hbm_to_vmem [thread:$0]  (!%p396_p11), %s126_s23, 16, %s128_s26, [#allocation3]  }
  0x14   : > { %p697_p3 = por %p69_p0, %p68_p13  ;;  %s56_s3 = ssub.s32 %s602_s13, %s790_s27 }
  0x15   : > { %p408_p7 = scmp.lt.s32.totalorder %s606_s14, 2  ;;  %p59_p10 = scmp.eq.s32.totalorder %s56_s3, 0 }
  0x16   : > { %s138_s4 = sand.u32 1, %s594_s11   ;;  %s386_s7 = sshll.u32 %s602_s13, 4 }
  0x17   : > { %s373_s5 = sshll.u32 %s138_s4, 4  ;;  %s149_s16 = scalar_lea.hbm %s775_s1, %s386_s7 }
  0x18   : > { %s712_s6 = scalar_select %p59_p10, %s594_s11, %s61_s28  }
  0x19   : > { %s142_s21 = scalar_lea.vmem [#allocation5], %s373_s5  ;;  %s151_s18 = sshll.u32 %s149_s16, 4  ;;  %s152_s18 = int_to_ptr.hbm [resolvable:$true] %s151_s18 }
  0x1a   : > { %s153_s22 = sshll.u32 %s142_s21, 4  ;;  %p400_p2 = pnand %p408_p7, %p697_p3  ;;  %s154_s22 = int_to_ptr.vmem [resolvable:$true] %s153_s22 }
  0x1b   : > { %s139_s23 = scalar_lea.sflag [#allocation6], %s138_s4  ;;  %162 = sbr.rel (%p681_p8) target bundleno = 171 (0xab), region = 28 }
  0x1c   : > { %402 = dma.hbm_to_vmem [thread:$0]  (!%p400_p2), %s152_s18, 256, %s154_s22, %s139_s23  }
  0x20   : > { %573 = dma.done.wait (%p658_p1), [#allocation3], 16  }
  0x21   : > { %575 = vsyncadd (%p658_p1), [#allocation3], 4294967280  ;;  %s727_s25 = sand.u32 1, %s590_s10  }
  0x22   : > { %s378_s26 = sshll.u32 %s727_s25, 4  ;;  %s170_s28 = scalar_lea.sflag [#allocation6], %s727_s25 }
  0x23   : > { %s173_s29 = scalar_lea.vmem [#allocation5], %s378_s26 }
  0x24   : > { %577 = dma.done.wait (%p668_p4), %s170_s28, 256  }
  0x25   : > { %579 = vsyncadd (%p668_p4), %s170_s28, 4294967040  ;;  %vm200_vm0 = vcmask 64512   ;;  %v199_v0 = vld [vmem:[%s173_s29 + $0x8] sm:$0xff]  ;;  %v198_v2 = vld [vmem:[%s173_s29] sm:$0xff]  ;;  %s379_s17 = sshll.u32 %s727_s25, 1  ;;  %s383_s24 = sshll.u32 %s598_s12, 1  ;;  %v250_v3 = vlaneseq }
  0x26   : > { %v197_v1 = vld [vmem:[#allocation2] sm:$0x1]  ;;  %239 = vmatpush.msra.mxu1 %v199_v0  ;;  %219 = vmatpush.msra.mxu0 %v198_v2  ;;  %s268_s5 = scalar_lea.hbm %s776_s2, %s383_s24  ;;  %s194_s19 = scalar_lea.vmem [#allocation7], %s379_s17  ;;  %vm247_vm1 = vcmask 1040384  }
  0x27   : > { %381 = vmatmul.msk.f32.vlgmr.msra.gmra.mxu1 %vm200_vm0, %v197_v1  ;;  %380 = vmatmul.msk.f32.vlgmr.msra.gmra.mxu0 %vm200_vm0, %v197_v1  ;;  %s270_s7 = sshll.u32 %s194_s19, 4  ;;  %s272_s8 = sshll.u32 %s268_s5, 4  ;;  %vm252_vm2 = vcmp.lt.s32.totalorder %v250_v3, 256  ;;  %s271_s7 = int_to_ptr.vmem [resolvable:$true] %s270_s7  ;;  %s273_s8 = int_to_ptr.hbm [resolvable:$true] %s272_s8 }
  0x28   : > { %s256_s15 = scalar_lea.sflag [#allocation4], %s727_s25  ;;  %s534_s12 = sshra.s32 %s273_s8, 4  ;;  %s535_s12 = int_to_ptr.hbm [resolvable:$true] %s534_s12 }
  0x29   : > { %s536_s16 = scalar_lea.hbm %s535_s12, 2  ;;  %s540_s18 = scalar_lea.hbm %s776_s2, 4 }
  0x2a   : > { %p537_p1 = scmp.ne.s32.totalorder %s535_s12, %s536_s16  ;;  %p541_p11 = scmp.lt.s32.totalorder %s535_s12, %s776_s2 }
  0x2b   : > { %p542_p12 = scmp.lt.s32.totalorder %s540_s18, %s536_s16 }
  0x2c   : > { %p538_p4 = pnand %p537_p1, %p703_p5 }
  0x2d   : > { %p543_p13 = por %p542_p12, %p541_p11 }
  0x2e   : > { %p539_p8 = pneg %p538_p4 }
  0x30   : > { %p544_p0 = pnand %p543_p13, %p539_p8 }
  0xa4   : > { %v241_v4 = vpop.f32.mrf.mxu1  ;;  %v221_v5 = vpop.f32.mrf.mxu0 }
  0xa5   : > { %v246_v6 = vrot.slane %v241_v4, 7 }
  0xa7   : > { %v248_v7 = vsel %vm247_vm1, %v221_v5, %v246_v6 }
  0xa8   : > { %254 = vst.msk [vmem:[%s194_s19] sm:$0x3] %vm252_vm2, %v248_v7 }
  0xa9   : > { %547 = shalt.err (!%p544_p0)
}
  0xaa   : > { %393 = dma.vmem_to_hbm [thread:$0]  (%p703_p5), %s271_s7, 32, %s273_s8, %s256_s15  }
  0xab PF: > { %s284_s25 = sand.u32 1, %s586_s9   ;;  %p404_p3 = pnand %p372_p9, %p673_p6 }
  0xac   : > { %s285_s28 = scalar_lea.sflag [#allocation4], %s284_s25 }
  0xad   : > { %p405_p7 = pneg %p404_p3 }
  0xaf   : > { %581 = dma.done.wait (%p405_p7), %s285_s28, 32  }
  0xb0   : > { %583 = vsyncadd (%p405_p7), %s285_s28, 4294967264  ;;  %s19_s14 = sadd.s32 1, %s606_s14   ;;  %s784_s9 = smov %s590_s10 }
  0xb1   : > { %p16_p10 = scmp.ge.s32.totalorder %s19_s14, 4   ;;  %s785_s10 = smov %s594_s11 }
  0xb2   : > { %s786_s11 = smov %s712_s6  ;;  %s787_s12 = smov %s602_s13 }
  0xb3   : > { %s788_s13 = smov %s790_s27  ;;  %18 = sbr.rel (!%p16_p10) target bundleno = 7 (0x7), region = 78 }
  0xb8   :  { %291 = vsyncpa [#allocation3], 1 }
  0xb9   :  { %293 = vsyncpa [#allocation3 + $0x1], 1 }
  0xba   :  { %294 = vsyncpa [#allocation6], 1 }
  0xbb   :  { %296 = vsyncpa [#allocation6 + $0x1], 1 }
  0xbc   :  { %297 = vsyncpa [#allocation4], 1 }
  0xbd   :  { %299 = vsyncpa [#allocation4 + $0x1], 1 }

</bundles_post_ra>
